<compile_context>
chip_gen: v5e
topology: v5e:2x2
jax: 0.10.0
libtpu: 0.0.40
codegen_flags: <defaults>
</compile_context>

<pallas_src>
import functools

import jax
import jax.numpy as jnp
from jax import lax
from jax.experimental import pallas as pl
from jax.experimental.pallas import tpu as pltpu

_LANE = 128


def _dice_partial_kernel(p_ref, t_ref, out_ref, *, hw, tsub, need_mask):
    """Per-(sample, spatial-chunk) partial reduction.

    p_ref: (C, tsub, 128) logits block (native dtype).
    t_ref: (tsub, 128) channel-1 target block (native dtype).
    out_ref: (8, 128) f32: row0 = sum(p1*t1), row1 = sum(p1), row2 = sum(t1),
             rows 3..7 zero (sublane padding for an aligned tile).
    """
    n_ch = p_ref.shape[0]

    # ---- Streaming softmax over the (leading, untiled) channel axis. ----
    # Never materializes a (C, tsub, 128) temporary: only ~6 (tsub, 128) f32
    # slabs are live at once regardless of C.  Channel max/sum are pure VPU
    # ops; exp goes to the EUP slot.
    m = p_ref[0].astype(jnp.float32)
    for c in range(1, n_ch):
        m = jnp.maximum(m, p_ref[c].astype(jnp.float32))

    denom = jnp.exp(p_ref[0].astype(jnp.float32) - m)
    e1 = jnp.exp(p_ref[1].astype(jnp.float32) - m)
    denom = denom + e1
    for c in range(2, n_ch):
        denom = denom + jnp.exp(p_ref[c].astype(jnp.float32) - m)

    # Exact division (kernel is memory-bound; approx reciprocal buys nothing
    # measurable and would cost reference accuracy).
    p1 = e1 / denom                               # (tsub, 128)
    t1 = t_ref[...].astype(jnp.float32)           # (tsub, 128)

    # Rows 3..7 are never read by the epilogue; zero them once so the aligned
    # (8, 128) writeback block is fully defined.
    out_ref[3:8, :] = jnp.zeros((5, _LANE), jnp.float32)

    def _store(p1v, t1v):
        # Lane-dense partials: collapse only the sublane axis here; the final
        # 128-lane collapse happens in plain JAX after the kernel.
        out_ref[0:1, :] = jnp.sum(p1v * t1v, axis=0, keepdims=True)
        out_ref[1:2, :] = jnp.sum(p1v, axis=0, keepdims=True)
        out_ref[2:3, :] = jnp.sum(t1v, axis=0, keepdims=True)

    if need_mask:
        # Only the LAST spatial tile can contain padding / out-of-bounds
        # garbage; interior tiles skip the iota/compare/where chain entirely.
        i = pl.program_id(1)
        last = pl.num_programs(1) - 1

        @pl.when(i == last)
        def _():
            row = lax.broadcasted_iota(jnp.int32, (tsub, _LANE), 0)
            lane = lax.broadcasted_iota(jnp.int32, (tsub, _LANE), 1)
            # int32 linear index: fine for any realistic H*W (< 2^31 elems).
            idx = (i * tsub + row) * _LANE + lane
            keep = idx < hw
            # jnp.where (not multiply) so NaN/Inf from garbage lanes dies.
            _store(jnp.where(keep, p1, 0.0), jnp.where(keep, t1, 0.0))

        @pl.when(i != last)
        def _():
            _store(p1, t1)
    else:
        _store(p1, t1)


def _vmem_budget_and_limit():
    """Per-generation VMEM budget for the resident working set + scoped limit."""
    cap = None
    try:
        info = pltpu.get_tpu_info()
        cap = getattr(info, "vmem_capacity_bytes", None)
    except Exception:  # pragma: no cover - best effort hardware query
        cap = None
    if not cap:
        cap = 64 * 1024 * 1024  # conservative fallback (v7x-sized)
    budget = min(cap // 3, 40 * 1024 * 1024)       # working-set budget
    limit = budget + 16 * 1024 * 1024              # scoped-VMEM request
    return budget, limit


def dice_loss(y_pred, y_true, smooth=1e-5, tile_elems=262144):
    """Pallas DiceLoss.forward.  y_pred / y_true in NCHW, any float dtype.

    Feed bf16 inputs where possible: the kernel is purely HBM-bandwidth-bound
    and upcasts to f32 in VMEM, so narrowing the HBM stream halves wall time
    (largest win on v5e's ~820 GB/s HBM).
    """
    N, C, H, W = y_pred.shape
    if C < 2:
        raise ValueError("DiceLoss uses channel 1; need at least 2 channels.")
    HW = H * W
    S = pl.cdiv(HW, _LANE)            # lane-major sublane rows per sample
    HW_pad = S * _LANE

    if HW_pad == HW:
        # Free row-major reshapes: spatial axis becomes (S, 128) lane-major,
        # channel stays a leading (non-tiled) dim.  Channel 1 of y_true is
        # picked out by the BlockSpec index_map -- no wrapper slice/copy.
        p = y_pred.reshape(N, C, S, _LANE)
        t = y_true.reshape(N, C, S, _LANE)
        t_is_4d = True
    else:
        # Rare ragged path (H*W not a multiple of 128): one padding pass so
        # the lane-major view stays a free reshape.  Pad the full logits (all
        # channels are needed) but only channel 1 of y_true (N*HW, not N*C*HW).
        pad = HW_pad - HW
        p = jnp.pad(y_pred.reshape(N, C, HW),
                    ((0, 0), (0, 0), (0, pad))).reshape(N, C, S, _LANE)
        t = jnp.pad(y_true[:, 1].reshape(N, HW),
                    ((0, 0), (0, pad))).reshape(N, S, _LANE)
        t_is_4d = False

    # ---- Tile sizing against the real VMEM working set. ----
    pb = jnp.dtype(y_pred.dtype).itemsize
    tb = jnp.dtype(y_true.dtype).itemsize
    # Resident bytes per sublane row (128 lanes):
    #   * double-buffered input blocks: 2 * (C*pb + tb) * 128
    #   * streamed-softmax f32 temporaries (m, e1, denom, p1, t1, products):
    #     ~6 f32 rows, independent of C.
    bytes_per_row = 2 * (C * pb + tb) * _LANE + 6 * 4 * _LANE
    vmem_budget, vmem_limit = _vmem_budget_and_limit()
    cap_rows = max(8, (vmem_budget // bytes_per_row // 8) * 8)

    tsub = min(max(tile_elems // _LANE, 8), pl.cdiv(S, 8) * 8, cap_rows)
    tsub = max(8, (tsub // 8) * 8)

    # v7x megacore guard: keep at least 2 grid cells so both TensorCores work.
    if N == 1 and S >= 16:
        tsub = min(tsub, max(8, (pl.cdiv(S, 2) // 8) * 8))

    num_tiles = pl.cdiv(S, tsub)
    need_mask = (num_tiles * tsub * _LANE) != HW

    kernel = functools.partial(
        _dice_partial_kernel, hw=HW, tsub=tsub, need_mask=need_mask)

    in_specs = [
        # All channels of the logits for this (sample, spatial chunk).
        pl.BlockSpec((None, C, tsub, _LANE), lambda n, i: (n, 0, i, 0)),
    ]
    if t_is_4d:
        # Channel 1 of y_true, read directly from the NCHW array.
        in_specs.append(
            pl.BlockSpec((None, None, tsub, _LANE), lambda n, i: (n, 1, i, 0)))
    else:
        in_specs.append(
            pl.BlockSpec((None, tsub, _LANE), lambda n, i: (n, i, 0)))

    partials = pl.pallas_call(
        kernel,
        out_shape=jax.ShapeDtypeStruct((N, num_tiles, 8, _LANE), jnp.float32),
        grid_spec=pltpu.PrefetchScalarGridSpec(
            num_scalar_prefetch=0,
            grid=(N, num_tiles),
            in_specs=in_specs,
            out_specs=pl.BlockSpec((None, None, 8, _LANE),
                                   lambda n, i: (n, i, 0, 0)),
        ),
        compiler_params=pltpu.CompilerParams(
            dimension_semantics=("parallel", "parallel"),
            vmem_limit_bytes=int(vmem_limit),
        ),
    )(p, t)

    # Tiny epilogue in plain JAX: collapse partials and form the dice scalar.
    sums = jnp.sum(partials[:, :, :3, :], axis=(0, 1, 3))   # (3,)
    dice = (2.0 * sums[0] + smooth) / (sums[1] + sums[2] + smooth)
    return (1.0 - dice).astype(jnp.float32)


def dice_loss_ref(y_pred, y_true, smooth=1e-5):
    """Pure-JAX reference matching the PyTorch forward exactly."""
    p1 = jax.nn.softmax(y_pred, axis=1)[:, 1].reshape(-1)
    t1 = y_true[:, 1].reshape(-1)
    inter = jnp.sum(p1 * t1)
    dice = (2.0 * inter + smooth) / (jnp.sum(p1) + jnp.sum(t1) + smooth)
    return 1.0 - dice


if __name__ == "__main__":
    key = jax.random.PRNGKey(0)
    k1, k2, k3, k4 = jax.random.split(key, 4)

    # Case 1: N=2, C=4, 16x16 (H*W is a multiple of 128): common path.
    N, C, H, W = 2, 4, 16, 16
    y_pred = jax.random.normal(k1, (N, C, H, W), dtype=jnp.float32)
    labels = jax.random.randint(k2, (N, H, W), 0, C)
    y_true = jnp.transpose(
        jax.nn.one_hot(labels, C, dtype=jnp.float32), (0, 3, 1, 2))
    loss = jax.block_until_ready(dice_loss(y_pred, y_true))
    ref = dice_loss_ref(y_pred, y_true)
    assert jnp.allclose(loss, ref, atol=1e-5, rtol=1e-5), (loss, ref)

    # Case 2: ragged spatial size (H*W not a multiple of 128) exercises the
    # channel-1-only padding + last-tile in-kernel mask path.
    N2, C2, H2, W2 = 1, 3, 10, 13
    y_pred2 = jax.random.normal(k3, (N2, C2, H2, W2), dtype=jnp.float32)
    labels2 = jax.random.randint(k4, (N2, H2, W2), 0, C2)
    y_true2 = jnp.transpose(
        jax.nn.one_hot(labels2, C2, dtype=jnp.float32), (0, 3, 1, 2))
    loss2 = jax.block_until_ready(dice_loss(y_pred2, y_true2))
    ref2 = dice_loss_ref(y_pred2, y_true2)
    assert jnp.allclose(loss2, ref2, atol=1e-5, rtol=1e-5), (loss2, ref2)

    # Case 3: bf16 inputs (halves HBM traffic; math stays f32 in-kernel).
    loss3 = jax.block_until_ready(
        dice_loss(y_pred.astype(jnp.bfloat16), y_true.astype(jnp.bfloat16)))
    ref3 = dice_loss_ref(y_pred.astype(jnp.bfloat16).astype(jnp.float32),
                         y_true.astype(jnp.bfloat16).astype(jnp.float32))
    assert jnp.allclose(loss3, ref3, atol=5e-3, rtol=5e-3), (loss3, ref3)

    print("KERNEL_OK")
</pallas_src>

<mosaic_0001>
module attributes {stable_mosaic.version = 11 : i64} {
  func.func @_dice_partial_kernel(%arg0: i32, %arg1: i32, %arg2: memref<1x4x8x128xf32, #tpu.memory_space<vmem>>, %arg3: memref<1x1x8x128xf32, #tpu.memory_space<vmem>>, %arg4: memref<1x1x8x128xf32, #tpu.memory_space<vmem>>) attributes {dimension_semantics = [#tpu.dimension_semantics<parallel>, #tpu.dimension_semantics<parallel>], iteration_bounds = array<i64: 2, 1>, scalar_prefetch = 0 : i64, scratch_operands = 0 : i64, tpu.core_type = #tpu.core_type<tc>, window_params = [{transform_indices = @transform_0, window_bounds = array<i64: 1, 4, 8, 128>}, {transform_indices = @transform_1, window_bounds = array<i64: 1, 1, 8, 128>}, {transform_indices = @transform_2, window_bounds = array<i64: 1, 1, 8, 128>}]} {
    %c0 = arith.constant 0 : index
    %c0_0 = arith.constant 0 : index
    %c0_1 = arith.constant 0 : index
    %c0_2 = arith.constant 0 : index
    %0 = vector.load %arg2[%c0, %c0_0, %c0_1, %c0_2] : memref<1x4x8x128xf32, #tpu.memory_space<vmem>>, vector<1x1x8x128xf32>
    %1 = vector.shape_cast %0 : vector<1x1x8x128xf32> to vector<8x128xf32>
    %c0_3 = arith.constant 0 : index
    %c1 = arith.constant 1 : index
    %c0_4 = arith.constant 0 : index
    %c0_5 = arith.constant 0 : index
    %2 = vector.load %arg2[%c0_3, %c1, %c0_4, %c0_5] : memref<1x4x8x128xf32, #tpu.memory_space<vmem>>, vector<1x1x8x128xf32>
    %3 = vector.shape_cast %2 : vector<1x1x8x128xf32> to vector<8x128xf32>
    %4 = arith.maximumf %1, %3 : vector<8x128xf32>
    %c0_6 = arith.constant 0 : index
    %c2 = arith.constant 2 : index
    %c0_7 = arith.constant 0 : index
    %c0_8 = arith.constant 0 : index
    %5 = vector.load %arg2[%c0_6, %c2, %c0_7, %c0_8] : memref<1x4x8x128xf32, #tpu.memory_space<vmem>>, vector<1x1x8x128xf32>
    %6 = vector.shape_cast %5 : vector<1x1x8x128xf32> to vector<8x128xf32>
    %7 = arith.maximumf %4, %6 : vector<8x128xf32>
    %c0_9 = arith.constant 0 : index
    %c3 = arith.constant 3 : index
    %c0_10 = arith.constant 0 : index
    %c0_11 = arith.constant 0 : index
    %8 = vector.load %arg2[%c0_9, %c3, %c0_10, %c0_11] : memref<1x4x8x128xf32, #tpu.memory_space<vmem>>, vector<1x1x8x128xf32>
    %9 = vector.shape_cast %8 : vector<1x1x8x128xf32> to vector<8x128xf32>
    %10 = arith.maximumf %7, %9 : vector<8x128xf32>
    %c0_12 = arith.constant 0 : index
    %c0_13 = arith.constant 0 : index
    %c0_14 = arith.constant 0 : index
    %c0_15 = arith.constant 0 : index
    %11 = vector.load %arg2[%c0_12, %c0_13, %c0_14, %c0_15] : memref<1x4x8x128xf32, #tpu.memory_space<vmem>>, vector<1x1x8x128xf32>
    %12 = vector.shape_cast %11 : vector<1x1x8x128xf32> to vector<8x128xf32>
    %13 = arith.subf %12, %10 : vector<8x128xf32>
    %14 = math.exp %13 : vector<8x128xf32>
    %c0_16 = arith.constant 0 : index
    %c1_17 = arith.constant 1 : index
    %c0_18 = arith.constant 0 : index
    %c0_19 = arith.constant 0 : index
    %15 = vector.load %arg2[%c0_16, %c1_17, %c0_18, %c0_19] : memref<1x4x8x128xf32, #tpu.memory_space<vmem>>, vector<1x1x8x128xf32>
    %16 = vector.shape_cast %15 : vector<1x1x8x128xf32> to vector<8x128xf32>
    %17 = arith.subf %16, %10 : vector<8x128xf32>
    %18 = math.exp %17 : vector<8x128xf32>
    %19 = arith.addf %14, %18 : vector<8x128xf32>
    %c0_20 = arith.constant 0 : index
    %c2_21 = arith.constant 2 : index
    %c0_22 = arith.constant 0 : index
    %c0_23 = arith.constant 0 : index
    %20 = vector.load %arg2[%c0_20, %c2_21, %c0_22, %c0_23] : memref<1x4x8x128xf32, #tpu.memory_space<vmem>>, vector<1x1x8x128xf32>
    %21 = vector.shape_cast %20 : vector<1x1x8x128xf32> to vector<8x128xf32>
    %22 = arith.subf %21, %10 : vector<8x128xf32>
    %23 = math.exp %22 : vector<8x128xf32>
    %24 = arith.addf %19, %23 : vector<8x128xf32>
    %c0_24 = arith.constant 0 : index
    %c3_25 = arith.constant 3 : index
    %c0_26 = arith.constant 0 : index
    %c0_27 = arith.constant 0 : index
    %25 = vector.load %arg2[%c0_24, %c3_25, %c0_26, %c0_27] : memref<1x4x8x128xf32, #tpu.memory_space<vmem>>, vector<1x1x8x128xf32>
    %26 = vector.shape_cast %25 : vector<1x1x8x128xf32> to vector<8x128xf32>
    %27 = arith.subf %26, %10 : vector<8x128xf32>
    %28 = math.exp %27 : vector<8x128xf32>
    %29 = arith.addf %24, %28 : vector<8x128xf32>
    %30 = arith.divf %18, %29 : vector<8x128xf32>
    %c0_28 = arith.constant 0 : index
    %c0_29 = arith.constant 0 : index
    %c0_30 = arith.constant 0 : index
    %c0_31 = arith.constant 0 : index
    %31 = vector.load %arg3[%c0_28, %c0_29, %c0_30, %c0_31] : memref<1x1x8x128xf32, #tpu.memory_space<vmem>>, vector<1x1x8x128xf32>
    %32 = vector.shape_cast %31 : vector<1x1x8x128xf32> to vector<8x128xf32>
    %cst = arith.constant 0.000000e+00 : f32
    %33 = vector.broadcast %cst : f32 to vector<5x128xf32>
    %c0_32 = arith.constant 0 : index
    %c0_33 = arith.constant 0 : index
    %c3_34 = arith.constant 3 : index
    %c0_35 = arith.constant 0 : index
    %34 = vector.load %arg4[%c0_32, %c0_33, %c3_34, %c0_35] : memref<1x1x8x128xf32, #tpu.memory_space<vmem>>, vector<1x1x5x128xf32>
    %35 = vector.shape_cast %34 : vector<1x1x5x128xf32> to vector<5x128xf32>
    %36 = vector.shape_cast %33 : vector<5x128xf32> to vector<1x1x5x128xf32>
    tpu.vector_store %arg4[%c0_32, %c0_33, %c3_34, %c0_35], %36 {strides = array<i32>} : memref<1x1x8x128xf32, #tpu.memory_space<vmem>>, vector<1x1x5x128xf32>,
    %c0_i32 = arith.constant 0 : i32
    %37 = arith.cmpi eq, %arg1, %c0_i32 : i32
    %38 = arith.extui %37 : i1 to i32
    %c0_i32_36 = arith.constant 0 : i32
    %39 = arith.cmpi ne, %38, %c0_i32_36 : i32
    scf.if %39 {
      %43 = tpu.iota {dimensions = array<i32: 0>} : vector<8x128xi32>
      %44 = tpu.iota {dimensions = array<i32: 1>} : vector<8x128xi32>
      %c8_i32 = arith.constant 8 : i32
      %45 = arith.muli %arg1, %c8_i32 : i32
      %46 = vector.broadcast %45 : i32 to vector<8x128xi32>
      %47 = arith.addi %46, %43 : vector<8x128xi32>
      %c128_i32 = arith.constant 128 : i32
      %48 = vector.broadcast %c128_i32 : i32 to vector<8x128xi32>
      %49 = arith.muli %47, %48 : vector<8x128xi32>
      %50 = arith.addi %49, %44 : vector<8x128xi32>
      %c256_i32 = arith.constant 256 : i32
      %51 = vector.broadcast %c256_i32 : i32 to vector<8x128xi32>
      %52 = arith.cmpi slt, %50, %51 : vector<8x128xi32>
      %cst_39 = arith.constant 0.000000e+00 : f32
      %53 = vector.broadcast %cst_39 : f32 to vector<8x128xf32>
      %54 = arith.select %52, %30, %53 : vector<8x128xi1>, vector<8x128xf32>
      %cst_40 = arith.constant 0.000000e+00 : f32
      %55 = vector.broadcast %cst_40 : f32 to vector<8x128xf32>
      %56 = arith.select %52, %32, %55 : vector<8x128xi1>, vector<8x128xf32>
      %57 = arith.mulf %54, %56 : vector<8x128xf32>
      %cst_41 = arith.constant dense<0.000000e+00> : vector<128xf32>
      %58 = vector.multi_reduction <add>, %57, %cst_41 [0] : vector<8x128xf32> to vector<128xf32>
      %59 = vector.shape_cast %58 : vector<128xf32> to vector<1x128xf32>
      %c0_42 = arith.constant 0 : index
      %c0_43 = arith.constant 0 : index
      %c0_44 = arith.constant 0 : index
      %c0_45 = arith.constant 0 : index
      %60 = vector.load %arg4[%c0_42, %c0_43, %c0_44, %c0_45] : memref<1x1x8x128xf32, #tpu.memory_space<vmem>>, vector<1x1x1x128xf32>
      %61 = vector.shape_cast %60 : vector<1x1x1x128xf32> to vector<1x128xf32>
      %62 = vector.shape_cast %59 : vector<1x128xf32> to vector<1x1x1x128xf32>
      tpu.vector_store %arg4[%c0_42, %c0_43, %c0_44, %c0_45], %62 {strides = array<i32>} : memref<1x1x8x128xf32, #tpu.memory_space<vmem>>, vector<1x1x1x128xf32>,
      %cst_46 = arith.constant dense<0.000000e+00> : vector<128xf32>
      %63 = vector.multi_reduction <add>, %54, %cst_46 [0] : vector<8x128xf32> to vector<128xf32>
      %64 = vector.shape_cast %63 : vector<128xf32> to vector<1x128xf32>
      %c0_47 = arith.constant 0 : index
      %c0_48 = arith.constant 0 : index
      %c1_49 = arith.constant 1 : index
      %c0_50 = arith.constant 0 : index
      %65 = vector.load %arg4[%c0_47, %c0_48, %c1_49, %c0_50] : memref<1x1x8x128xf32, #tpu.memory_space<vmem>>, vector<1x1x1x128xf32>
      %66 = vector.shape_cast %65 : vector<1x1x1x128xf32> to vector<1x128xf32>
      %67 = vector.shape_cast %64 : vector<1x128xf32> to vector<1x1x1x128xf32>
      tpu.vector_store %arg4[%c0_47, %c0_48, %c1_49, %c0_50], %67 {strides = array<i32>} : memref<1x1x8x128xf32, #tpu.memory_space<vmem>>, vector<1x1x1x128xf32>,
      %cst_51 = arith.constant dense<0.000000e+00> : vector<128xf32>
      %68 = vector.multi_reduction <add>, %56, %cst_51 [0] : vector<8x128xf32> to vector<128xf32>
      %69 = vector.shape_cast %68 : vector<128xf32> to vector<1x128xf32>
      %c0_52 = arith.constant 0 : index
      %c0_53 = arith.constant 0 : index
      %c2_54 = arith.constant 2 : index
      %c0_55 = arith.constant 0 : index
      %70 = vector.load %arg4[%c0_52, %c0_53, %c2_54, %c0_55] : memref<1x1x8x128xf32, #tpu.memory_space<vmem>>, vector<1x1x1x128xf32>
      %71 = vector.shape_cast %70 : vector<1x1x1x128xf32> to vector<1x128xf32>
      %72 = vector.shape_cast %69 : vector<1x128xf32> to vector<1x1x1x128xf32>
      tpu.vector_store %arg4[%c0_52, %c0_53, %c2_54, %c0_55], %72 {strides = array<i32>} : memref<1x1x8x128xf32, #tpu.memory_space<vmem>>, vector<1x1x1x128xf32>,
    } else {
    }
    %c0_i32_37 = arith.constant 0 : i32
    %40 = arith.cmpi ne, %arg1, %c0_i32_37 : i32
    %41 = arith.extui %40 : i1 to i32
    %c0_i32_38 = arith.constant 0 : i32
    %42 = arith.cmpi ne, %41, %c0_i32_38 : i32
    scf.if %42 {
      %43 = arith.mulf %30, %32 : vector<8x128xf32>
      %cst_39 = arith.constant dense<0.000000e+00> : vector<128xf32>
      %44 = vector.multi_reduction <add>, %43, %cst_39 [0] : vector<8x128xf32> to vector<128xf32>
      %45 = vector.shape_cast %44 : vector<128xf32> to vector<1x128xf32>
      %c0_40 = arith.constant 0 : index
      %c0_41 = arith.constant 0 : index
      %c0_42 = arith.constant 0 : index
      %c0_43 = arith.constant 0 : index
      %46 = vector.load %arg4[%c0_40, %c0_41, %c0_42, %c0_43] : memref<1x1x8x128xf32, #tpu.memory_space<vmem>>, vector<1x1x1x128xf32>
      %47 = vector.shape_cast %46 : vector<1x1x1x128xf32> to vector<1x128xf32>
      %48 = vector.shape_cast %45 : vector<1x128xf32> to vector<1x1x1x128xf32>
      tpu.vector_store %arg4[%c0_40, %c0_41, %c0_42, %c0_43], %48 {strides = array<i32>} : memref<1x1x8x128xf32, #tpu.memory_space<vmem>>, vector<1x1x1x128xf32>,
      %cst_44 = arith.constant dense<0.000000e+00> : vector<128xf32>
      %49 = vector.multi_reduction <add>, %30, %cst_44 [0] : vector<8x128xf32> to vector<128xf32>
      %50 = vector.shape_cast %49 : vector<128xf32> to vector<1x128xf32>
      %c0_45 = arith.constant 0 : index
      %c0_46 = arith.constant 0 : index
      %c1_47 = arith.constant 1 : index
      %c0_48 = arith.constant 0 : index
      %51 = vector.load %arg4[%c0_45, %c0_46, %c1_47, %c0_48] : memref<1x1x8x128xf32, #tpu.memory_space<vmem>>, vector<1x1x1x128xf32>
      %52 = vector.shape_cast %51 : vector<1x1x1x128xf32> to vector<1x128xf32>
      %53 = vector.shape_cast %50 : vector<1x128xf32> to vector<1x1x1x128xf32>
      tpu.vector_store %arg4[%c0_45, %c0_46, %c1_47, %c0_48], %53 {strides = array<i32>} : memref<1x1x8x128xf32, #tpu.memory_space<vmem>>, vector<1x1x1x128xf32>,
      %cst_49 = arith.constant dense<0.000000e+00> : vector<128xf32>
      %54 = vector.multi_reduction <add>, %32, %cst_49 [0] : vector<8x128xf32> to vector<128xf32>
      %55 = vector.shape_cast %54 : vector<128xf32> to vector<1x128xf32>
      %c0_50 = arith.constant 0 : index
      %c0_51 = arith.constant 0 : index
      %c2_52 = arith.constant 2 : index
      %c0_53 = arith.constant 0 : index
      %56 = vector.load %arg4[%c0_50, %c0_51, %c2_52, %c0_53] : memref<1x1x8x128xf32, #tpu.memory_space<vmem>>, vector<1x1x1x128xf32>
      %57 = vector.shape_cast %56 : vector<1x1x1x128xf32> to vector<1x128xf32>
      %58 = vector.shape_cast %55 : vector<1x128xf32> to vector<1x1x1x128xf32>
      tpu.vector_store %arg4[%c0_50, %c0_51, %c2_52, %c0_53], %58 {strides = array<i32>} : memref<1x1x8x128xf32, #tpu.memory_space<vmem>>, vector<1x1x1x128xf32>,
    } else {
    }
    return
  }
  func.func @transform_0(%arg0: i32, %arg1: i32) -> (i32, i32, i32, i32) {
    %c0_i32 = arith.constant 0 : i32
    %c0_i32_0 = arith.constant 0 : i32
    %c0_i32_1 = arith.constant 0 : i32
    return %arg0, %c0_i32, %arg1, %c0_i32_0 : i32, i32, i32, i32
  }
  func.func @transform_1(%arg0: i32, %arg1: i32) -> (i32, i32, i32, i32) {
    %c1_i32 = arith.constant 1 : i32
    %c0_i32 = arith.constant 0 : i32
    %c0_i32_0 = arith.constant 0 : i32
    return %arg0, %c1_i32, %arg1, %c0_i32 : i32, i32, i32, i32
  }
  func.func @transform_2(%arg0: i32, %arg1: i32) -> (i32, i32, i32, i32) {
    %c0_i32 = arith.constant 0 : i32
    %c0_i32_0 = arith.constant 0 : i32
    %c0_i32_1 = arith.constant 0 : i32
    return %arg0, %arg1, %c0_i32, %c0_i32_0 : i32, i32, i32, i32
  }
}

</mosaic_0001>

<bundles_post_ra>
// kernel: tpu_custom_call.1
= control target key start
LH: loop header
LB: loop body
LE: loop exit
PB: predicated region body
PF: predicated region fallthrough
CT: control target
= control target key end

     0   :  { %7 = vsyncpa [#allocation3], 0  ;;  %s881_s0 = inlined_call_operand.hbm [shape: f32[2,4,2,128], index: 0, kind: input, shape index: {}]   ;;  %s882_s1 = inlined_call_operand.hbm [shape: f32[2,4,2,128], index: 1, kind: input, shape index: {}]   ;;  %s883_s2 = inlined_call_operand.hbm [shape: f32[2,1,8,128], index: 2, kind: output, shape index: {}]  }
   0x1   :  { %9 = vsyncpa [#allocation3 + $0x1], 0 }
   0x2   :  { %10 = vsyncpa [#allocation6], 0 }
   0x3   :  { %12 = vsyncpa [#allocation6 + $0x1], 0 }
   0x4   :  { %13 = vsyncpa [#allocation4], 0 }
   0x5   :  { %15 = vsyncpa [#allocation4 + $0x1], 0  ;;  %s738_s9 = smov 0   ;;  %s740_s10 = smov 0  }
   0x6   :  { %s742_s11 = smov 0   ;;  %s744_s12 = smov 0  }
   0x7   :  { %s746_s13 = smov 0   ;;  %s748_s14 = smov 0  }
   0x8 LB: > { %s503_s15 = sadd.s32 4294967295, %s713_s14   ;;  %s504_s16 = sadd.s32 4294967294, %s713_s14   ;;  %s713_s14 = sphi %s748_s14, %s21_s14   ;;  %s709_s13 = sphi %s746_s13, %s892_s13   ;;  %s705_s12 = sphi %s744_s12, %s891_s12   ;;  %s701_s11 = sphi %s742_s11, %s890_s11   ;;  %s697_s10 = sphi %s740_s10, %s889_s10   ;;  %s693_s9 = sphi %s738_s9, %s888_s9  }
   0x9   : > { %s33_s17 = sadd.s32 1, %s709_s13  ;;  %s42_s18 = sadd.s32 1, %s701_s11 }
   0xa   : > { %p35_p0 = scmp.ge.s32.totalorder %s33_s17, 2  ;;  %p49_p1 = scmp.ne.s32.totalorder %s701_s11, %s697_s10 }
   0xb   : > { %p50_p2 = scmp.eq.s32.totalorder %s713_s14, 0  ;;  %p55_p3 = scmp.ne.s32.totalorder %s697_s10, %s693_s9 }
   0xc   : > { %s894_s17 = smov (%p35_p0, %s33_s17), 0  ;;  %p56_p5 = scmp.eq.s32.totalorder %s503_s15, 0 }
   0xd   : > { %p779_p4 = por %p50_p2, %p49_p1  ;;  %s37_s20 = ssub.s32 %s709_s13, %s894_s17 }
   0xe   : > { %p109_p6 = scmp.eq.s32.totalorder %s503_s15, 1  ;;  %p40_p7 = scmp.eq.s32.totalorder %s37_s20, 0 }
   0xf   : > { %p785_p8 = por %p56_p5, %p55_p3  ;;  %p115_p10 = scmp.eq.s32.totalorder %s504_s16, 1 }
  0x10   : > { %p789_p9 = por %p109_p6, %p49_p1  ;;  %p506_p12 = scmp.ge.s32.totalorder %s713_s14, 2 }
  0x11   : > { %s794_s23 = scalar_select %p40_p7, %s701_s11, %s42_s18  }
  0x12   : > { %p796_p11 = por %p115_p10, %p55_p3  ;;  %131 = sbr.rel (%p506_p12) target bundleno = 51 (0x33), region = 16 }
  0x17   : > { %134 = sbr.rel (!%p779_p4) target bundleno = 41 (0x29), region = 20 }
  0x1c   : > { %s135_s25 = sand.u32 1, %s701_s11  }
  0x1d   : > { %s507_s26 = sshll.u32 %s135_s25, 5  ;;  %s136_s27 = scalar_lea.sflag [#allocation3], %s135_s25 }
  0x1e   : > { %s139_s28 = scalar_lea.vmem [#allocation2], %s507_s26 }
  0x1f   : > { %145 = vsyncadd %s136_s27, 384  ;;  %s526_s29 = sshll.u32 %s709_s13, 3  ;;  %s157_s30 = sld [smem:[#allocation0]]  }
  0x20   : > { %s150_s5 = scalar_lea.hbm %s881_s0, %s526_s29  ;;  %s167_s6 = sshll.u32 %s139_s28, 4  ;;  %s168_s6 = int_to_ptr.vmem [resolvable:$true] %s167_s6 }
  0x21   : > { %s165_s7 = sshll.u32 %s150_s5, 4  ;;  %s715_s8 = smov 32   ;;  %s166_s7 = int_to_ptr.hbm [resolvable:$true] %s165_s7 }
  0x22   : > { %174 = sst [smem:[#allocation9]] %s715_s8  ;;  %s716_s15 = smov 128  }
  0x23   : > { %176 = sst [smem:[#allocation9 + $0x1]] %s716_s15  ;;  %s717_s18 = smov 1  }
  0x24   : > { %178 = sst [smem:[#allocation9 + $0x2]] %s717_s18  ;;  %s718_s25 = smov 2  }
  0x25   : > { %s510_s16 = sshll.u32 %s157_s30, 26  ;;  %180 = sst [smem:[#allocation9 + $0x3]] %s715_s8 }
  0x26   : > { %s511_s20 = sadd.s32 134217728, %s510_s16  ;;  %182 = sst [smem:[#allocation9 + $0x4]] %s715_s8 }
  0x27   : > { %184 = sst [smem:[#allocation9 + $0x5]] %s718_s25  ;;  %s719_s26 = smov [#allocation8]  }
  0x28   : > { %186 = dma.general %s166_s7, 128, %s168_s6, %s136_s27, %s719_s26, [#allocation9], %s511_s20, 0  }
  0x29 PF: > { %189 = sbr.rel (!%p779_p4) target bundleno = 51 (0x33), region = 24  ;;  %s190_s28 = sand.u32 (%p779_p4), 1, %s701_s11  }
  0x2a   : > { %s512_s29 = sshll.u32 (%p779_p4), %s190_s28, 3  ;;  %s191_s3 = scalar_lea.sflag (%p779_p4), [#allocation6], %s190_s28 }
  0x2b   : > { %s194_s4 = scalar_lea.vmem (%p779_p4), [#allocation5], %s512_s29 }
  0x2e   : > { %200 = vsyncadd %s191_s3, 96  ;;  %s527_s30 = sshll.u32 %s709_s13, 3  ;;  %s210_s5 = sshll.u32 %s194_s4, 4  ;;  %s211_s5 = int_to_ptr.vmem [resolvable:$true] %s210_s5 }
  0x2f   : > { %s436_s8 = scalar_lea.hbm %s882_s1, %s527_s30  ;;  %s720_s6 = smov 32  }
  0x30   : > { %s437_s18 = scalar_lea.hbm %s436_s8, 2  ;;  %s721_s19 = smov 2  }
  0x31   : > { %s208_s27 = sshll.u32 %s437_s18, 4  ;;  %s209_s27 = int_to_ptr.hbm [resolvable:$true] %s208_s27 }
  0x32   : > { %216 = dma.hbm_to_vmem [thread:$0]  %s209_s27, 32, %s211_s5, %s191_s3, %s720_s6, %s720_s6, %s721_s19  }
  0x33 PF: > { %p515_p13 = scmp.ge.s32.totalorder %s713_s14, 1  ;;  %p218_p0 = scmp.lt.s32.totalorder %s713_s14, 3 }
  0x35   : > { %p219_p1 = pnand %p515_p13, %p218_p0 }
  0x36   : > { %s820_s7 = sand.u32 (!%p219_p1), 1, %s697_s10  }
  0x37   : > { %222 = sbr.rel (%p219_p1) target bundleno = 126 (0x7e), region = 28  ;;  %s516_s20 = sshll.u32 (!%p219_p1), %s820_s7, 5 }
  0x38   : > { %s225_s25 = scalar_lea.sflag (!%p219_p1), [#allocation3], %s820_s7  ;;  %s228_s26 = scalar_lea.vmem (!%p219_p1), [#allocation2], %s516_s20 }
  0x3c   : > { %680 = dma.done.wait (%p785_p8), %s225_s25, 512  }
  0x3d   : > { %682 = vsyncadd (%p785_p8), %s225_s25, 4294966784  ;;  %s517_s28 = sshll.u32 %s820_s7, 3  ;;  %s235_s29 = scalar_lea.sflag [#allocation6], %s820_s7 }
  0x3e   : > { %s238_s3 = scalar_lea.vmem [#allocation5], %s517_s28 }
  0x3f   : > { %684 = dma.done.wait (%p785_p8), %s235_s29, 128  }
  0x40   : > { %686 = vsyncadd (%p785_p8), %s235_s29, 4294967168  ;;  %s834_s4 = scalar_lea.vmem [#allocation7], %s517_s28  ;;  %v722_v0 = vmov 0.0   ;;  %v271_v1 = vld [vmem:[%s228_s26] sm:$0xff]  ;;  %v519_v2 = vld [vmem:[%s228_s26 + $0x8] sm:$0xff]  ;;  %v317_v7 = vlaneseq  ;;  %s523_s21 = sshll.u32 %s705_s12, 3 }
  0x41   : > { %312 = vst [vmem:[%s834_s4 + $0x3] sm:$0x1f] %v722_v0  ;;  %v520_v3 = vld [vmem:[%s228_s26 + $0x10] sm:$0xff]  ;;  %v274_v4 = vmax.f32 %v271_v1, %v519_v2  ;;  %v521_v5 = vld [vmem:[%s228_s26 + $0x18] sm:$0xff]  ;;  %v311_v21 = vld [vmem:[%s238_s3] sm:$0xff]  ;;  %s389_s15 = scalar_lea.hbm %s883_s2, %s523_s21  ;;  %s391_s16 = sshll.u32 %s834_s4, 4  ;;  %s392_s16 = int_to_ptr.vmem [resolvable:$true] %s391_s16 }
  0x42   : > { %v318_v9 = vshrl.u32 %v317_v7, 7  ;;  %v320_v14 = vand.u32 127, %v317_v7  ;;  %s393_s8 = sshll.u32 %s389_s15, 4  ;;  %s378_s12 = scalar_lea.sflag [#allocation4], %s820_s7  ;;  %s394_s8 = int_to_ptr.hbm [resolvable:$true] %s393_s8 }
  0x43   : > { %v277_v6 = vmax.f32 %v274_v4, %v520_v3  ;;  %s641_s18 = sshra.s32 %s394_s8, 4  ;;  %s647_s20 = scalar_lea.hbm %s883_s2, 16  ;;  %s642_s18 = int_to_ptr.hbm [resolvable:$true] %s641_s18 }
  0x44   : > { %v324_v15 = vmul.u32 128, %v318_v9  ;;  %s643_s27 = scalar_lea.hbm %s642_s18, 8  ;;  %p648_p5 = scmp.lt.s32.totalorder %s642_s18, %s883_s2 }
  0x45   : > { %v280_v8 = vmax.f32 %v277_v6, %v521_v5  ;;  %p644_p2 = scmp.ne.s32.totalorder %s642_s18, %s643_s27  ;;  %p649_p6 = scmp.lt.s32.totalorder %s647_s20, %s643_s27 }
  0x46   : > { %v325_v20 = vadd.s32 %v324_v15, %v320_v14 }
  0x47   : > { %v281_v10 = vsub.f32 %v271_v1, %v280_v8  ;;  %v284_v11 = vsub.f32 %v519_v2, %v280_v8  ;;  %v288_v12 = vsub.f32 %v520_v3, %v280_v8  ;;  %v292_v13 = vsub.f32 %v521_v5, %v280_v8  ;;  %p645_p3 = pnand %p644_p2, %p789_p9  ;;  %p650_p7 = por %p649_p6, %p648_p5 }
  0x48   : > { %vm326_vm0 = vcmp.lt.s32.totalorder %v325_v20, 256 }
  0x49   : > { %v282_v16 = vmul.f32 1.442695, %v281_v10  ;;  %v285_v17 = vmul.f32 1.442695, %v284_v11  ;;  %v289_v18 = vmul.f32 1.442695, %v288_v12  ;;  %p646_p4 = pneg %p645_p3 }
  0x4a   : > { %v293_v19 = vmul.f32 1.442695, %v292_v13  ;;  %v328_v22 = vsel %vm326_vm0, %v311_v21, 0.0 }
  0x4b   : > { %593 = vpow2.f32 %v282_v16  ;;  %v344_v23 = vrot.slane %v328_v22, 4  ;;  %p651_p8 = pnand %p650_p7, %p646_p4 }
  0x4c   : > { %595 = vpow2.f32 %v285_v17 }
  0x4d   : > { %597 = vpow2.f32 %v289_v18  ;;  %v345_v25 = vadd.f32 %v344_v23, %v328_v22 }
  0x4e   : > { %599 = vpow2.f32 %v293_v19 }
  0x4f   : > { %v346_v29 = vrot.slane %v345_v25, 2 }
  0x51   : > { %v594_v24 = vpop.eup %593  ;;  %v347_v32 = vadd.f32 %v346_v29, %v345_v25 }
  0x52   : > { %v596_v26 = vpop.eup %595 }
  0x53   : > { %v598_v27 = vpop.eup %597  ;;  %v287_v28 = vadd.f32 %v596_v26, %v594_v24  ;;  %v348_v34 = vrot.slane %v347_v32, 1 }
  0x54   : > { %v600_v30 = vpop.eup %599 }
  0x55   : > { %v291_v31 = vadd.f32 %v598_v27, %v287_v28  ;;  %v349_v35 = vadd.f32 %v348_v34, %v347_v32 }
  0x57   : > { %v295_v33 = vadd.f32 %v600_v30, %v291_v31  ;;  %350 = vst [vmem:[%s834_s4 + $0x2] sm:$0x1] %v349_v35 }
  0x59   : > { %601 = vrcp.f32 %v295_v33  ;;  %v307_v38 = vand.u32 2147483648, %v295_v33  ;;  %vm301_vm1 = vweird.f32 %v295_v33  ;;  %v305_v40 = vand.u32 2147483647, %v295_v33 }
  0x5b   : > { %v308_v42 = vor.u32 1.1754944e-38, %v307_v38  ;;  %vm306_vm4 = vcmp.eq.f32.partialorder %v305_v40, 8.507059e+37 }
  0x5f   : > { %v602_v36 = vpop.eup %601 }
  0x60   : > { %v297_v37 = vmul.f32 %v602_v36, %v295_v33  ;;  %vm302_vm2 = vweird.f32 %v602_v36 }
  0x61   : > { %vm303_vm3 = vmor %vm301_vm1, %vm302_vm2 }
  0x62   : > { %v298_v39 = vsub.f32 1.0, %v297_v37 }
  0x64   : > { %v299_v41 = vmul.f32 %v602_v36, %v298_v39 }
  0x66   : > { %v300_v43 = vadd.f32 %v602_v36, %v299_v41 }
  0x68   : > { %v304_v44 = vsel %vm303_vm3, %v602_v36, %v300_v43 }
  0x69   : > { %v309_v45 = vsel %vm306_vm4, %v308_v42, %v304_v44 }
  0x6a   : > { %v310_v46 = vmul.f32 %v596_v26, %v309_v45 }
  0x6c   : > { %v327_v47 = vsel %vm326_vm0, %v310_v46, 0.0 }
  0x6d   : > { %v329_v48 = vmul.f32 %v328_v22, %v327_v47  ;;  %v337_v49 = vrot.slane %v327_v47, 4 }
  0x6f   : > { %v330_v50 = vrot.slane %v329_v48, 4  ;;  %v338_v51 = vadd.f32 %v337_v49, %v327_v47 }
  0x71   : > { %v331_v52 = vadd.f32 %v330_v50, %v329_v48  ;;  %v339_v53 = vrot.slane %v338_v51, 2 }
  0x73   : > { %v332_v54 = vrot.slane %v331_v52, 2  ;;  %v340_v55 = vadd.f32 %v339_v53, %v338_v51 }
  0x75   : > { %v333_v56 = vadd.f32 %v332_v54, %v331_v52  ;;  %v341_v57 = vrot.slane %v340_v55, 1 }
  0x77   : > { %v334_v58 = vrot.slane %v333_v56, 1  ;;  %v342_v59 = vadd.f32 %v341_v57, %v340_v55 }
  0x79   : > { %v335_v60 = vadd.f32 %v334_v58, %v333_v56  ;;  %343 = vst [vmem:[%s834_s4 + $0x1] sm:$0x1] %v342_v59 }
  0x7b   : > { %336 = vst [vmem:[%s834_s4] sm:$0x1] %v335_v60 }
  0x7c   : > { %654 = shalt.err (!%p651_p8)
}
  0x7d   : > { %530 = dma.vmem_to_hbm [thread:$0]  (%p789_p9), %s392_s16, 128, %s394_s8, %s378_s12  }
  0x7e PF: > { %s405_s7 = sand.u32 1, %s693_s9   ;;  %p533_p10 = pnand %p506_p12, %p796_p11 }
  0x7f   : > { %s406_s28 = scalar_lea.sflag [#allocation4], %s405_s7 }
  0x80   : > { %p534_p13 = pneg %p533_p10 }
  0x82   : > { %688 = dma.done.wait (%p534_p13), %s406_s28, 128  }
  0x83   : > { %690 = vsyncadd (%p534_p13), %s406_s28, 4294967168  ;;  %s21_s14 = sadd.s32 1, %s713_s14   ;;  %s888_s9 = smov %s697_s10 }
  0x84   : > { %p18_p0 = scmp.ge.s32.totalorder %s21_s14, 4   ;;  %s889_s10 = smov %s701_s11 }
  0x85   : > { %s890_s11 = smov %s794_s23  ;;  %s891_s12 = smov %s709_s13 }
  0x86   : > { %s892_s13 = smov %s894_s17  ;;  %20 = sbr.rel (!%p18_p0) target bundleno = 8 (0x8), region = 102 }
  0x8b   :  { %412 = vsyncpa [#allocation3], 1 }
  0x8c   :  { %414 = vsyncpa [#allocation3 + $0x1], 1 }
  0x8d   :  { %415 = vsyncpa [#allocation6], 1 }
  0x8e   :  { %417 = vsyncpa [#allocation6 + $0x1], 1 }
  0x8f   :  { %418 = vsyncpa [#allocation4], 1 }
  0x90   :  { %420 = vsyncpa [#allocation4 + $0x1], 1 }

</bundles_post_ra>
